<compile_context>
chip_gen: v5e
topology: v5e:2x2
jax: 0.10.0
libtpu: 0.0.40
codegen_flags: <defaults>
</compile_context>

<pallas_src>
import jax
import jax.numpy as jnp
from jax import lax
from jax.experimental import pallas as pl
from jax.experimental.pallas import tpu as pltpu

# ---- configuration (mirrors ComplexAspectModel.__init__ with model_type='cnn') ----
B = 2          # batch
S = 8          # sequence length of pretrained-model hidden states
H = 32         # pretrained_model.config.hidden_size
A = 4          # num_aspects
ACLS = 4       # num_aspect_classes
C1 = 8         # params['num_channels']
K1 = 4         # params['kernel_size']
P1 = 2         # params['padding']
C2 = C1 // 2   # int(num_channels / 2)
K2 = K1 // 2   # int(kernel_size / 2)
P2 = P1 // 2   # int(padding / 2)
L1 = H + 2 * P1 - K1 + 1       # conv1 output length (33)
L2 = L1 + 2 * P2 - K2 + 1      # conv2 output length (34)
FC1 = 512
GPAD = 8                        # lhs free-dim padding for the fc1 dot

# Lane packing: each sample owns a HALF-lane segment of one 128-lane row.
HALF = 64
LANES = B * HALF               # 128
assert LANES == 128
assert H + 2 * P1 <= HALF and L2 <= HALF and A * ACLS <= LANES

# ---- small-parameter slab row offsets (all loads at 8-aligned sublane offsets) ----
_W1 = 0                        # K1*A*C1 = 128 rows: conv1 taps, lane-broadcast
_B1 = _W1 + K1 * A * C1        # 128: conv1 bias, lane-broadcast (A*C1 rows)
_W2 = _B1 + A * C1             # 160: conv2 block-diag taps (K2*A*C2 rows, A*C1 lanes)
_B2 = _W2 + K2 * A * C2        # 192: conv2 bias, lane-broadcast (A*C2 rows)
_M1 = _B2 + A * C2             # 208: conv1 valid-lane mask (1 row)
_M2 = _M1 + 8                  # 216: conv2 valid-lane mask (1 row)
_FB2 = _M2 + 8                 # 224: fc2 bias (1 row, A*ACLS lanes)
SLAB_ROWS = _FB2 + 8           # 232


def _shift_left(v, k):
    """Circular lane shift: out[..., l] = v[..., (l + k) % LANES]."""
    if k == 0:
        return v
    return pltpu.roll(v, LANES - k, axis=1)   # positive shift amount only


def aspect_kernel(hs_ref, slab_ref, fc1_ref, fc2_ref, out_ref):
    f32 = jnp.float32

    # distilbert branch: last_hidden_state.mean(dim=1).  hs is pre lane-packed
    # (sample b at lanes [b*64+P1, b*64+P1+H)), so the sublane mean directly
    # yields the zero-padded, lane-packed conv1 input row.
    xfull = jnp.mean(hs_ref[...], axis=0, keepdims=True)                     # (1, 128)

    # ---- conv1 (all aspects & samples): K1 shifted broadcast-FMAs on the VPU ----
    acc1 = slab_ref[_W1:_W1 + A * C1, :] * xfull
    for k in range(1, K1):
        acc1 = acc1 + (slab_ref[_W1 + k * A * C1:_W1 + (k + 1) * A * C1, :]
                       * _shift_left(xfull, k))
    y1 = jnp.maximum(acc1 + slab_ref[_B1:_B1 + A * C1, :], 0.0)
    y1 = y1 * slab_ref[_M1:_M1 + 1, :]                                       # (A*C1, 128)

    # ---- conv2 (all aspects & samples): K2 block-diagonal MXU dots, accumulated ----
    ypad = pltpu.roll(y1, P2, axis=1)          # left zero-pad via right shift (masked lanes)
    acc2 = slab_ref[_B2:_B2 + A * C2, :]
    for k in range(K2):
        w2k = slab_ref[_W2 + k * A * C2:_W2 + (k + 1) * A * C2, 0:A * C1]    # (16, 32)
        acc2 = acc2 + jnp.dot(w2k, _shift_left(ypad, k),
                              preferred_element_type=f32)
    y2 = jnp.maximum(acc2, 0.0) * slab_ref[_M2:_M2 + 1, :]                   # (A*C2, 128)

    # ---- global max-pool, all rows / both samples at once (values >= 0 post-ReLU) ----
    g0 = jnp.max(y2[:, :HALF], axis=1, keepdims=True)                        # (A*C2, 1)
    g1 = jnp.max(y2[:, HALF:], axis=1, keepdims=True)                        # (A*C2, 1)
    gcols = jnp.concatenate(
        [g0, g1, jnp.zeros((A * C2, GPAD - B), f32)], axis=1)                # (A*C2, 8)

    # ---- fc1 (all aspects & samples): ONE block-diagonal MXU dot.  The sublane->lane
    # move of the pooled features is fused into the dot (lhs-contracted on dim 0);
    # the fc1 bias rides as the trailing weight row.
    h1 = lax.dot_general(gcols, fc1_ref[0:A * C2, :],
                         dimension_numbers=(((0,), (0,)), ((), ())),
                         preferred_element_type=f32)[0:B, :]                 # (B, A*FC1)
    h1 = jnp.maximum(h1 + fc1_ref[A * C2:A * C2 + 1, :], 0.0)
    # TODO(synk): nn.Dropout(p=0.4) is identity in eval mode; training-mode dropout
    # (random masking) is intentionally not implemented.

    # ---- fc2 (all aspects & samples): ONE block-diagonal MXU dot (rhs-transposed,
    # lane-dense (A*ACLS, A*FC1) native weight layout) ----
    h2 = lax.dot_general(h1, fc2_ref[...],
                         dimension_numbers=(((1,), (1,)), ((), ())),
                         preferred_element_type=f32)                         # (B, A*ACLS)
    h2 = jnp.maximum(h2 + slab_ref[_FB2:_FB2 + 1, 0:A * ACLS], 0.0)

    # ---- per-aspect log_softmax over the 4-class lane groups; single lane-dense store ----
    outs = []
    for a in range(A):
        z = h2[:, a * ACLS:(a + 1) * ACLS]                                   # (B, ACLS)
        z = z - jnp.max(z, axis=1, keepdims=True)
        lse = jnp.log(jnp.sum(jnp.exp(z), axis=1, keepdims=True))
        outs.append(z - lse)
    out_ref[...] = jnp.concatenate(outs, axis=1)                             # (B, A*ACLS)


def complex_aspect_forward(hs, params):
    """hs: (B, S, H) pretrained-model last_hidden_state. Returns (A, B, ACLS)."""
    f32 = jnp.float32

    # -- activation layout plumbing: lane-pack both samples, conv1 zero pad built in --
    hs_pad = jnp.pad(hs.astype(f32), ((0, 0), (0, 0), (P1, HALF - P1 - H)))  # (B, S, 64)
    hs_packed = jnp.transpose(hs_pad, (1, 0, 2)).reshape(S, LANES)           # (S, 128)

    # -- small-parameter slab: ONE operand / ONE DMA for conv params, masks, fc2 bias --
    w1b = jnp.broadcast_to(
        jnp.transpose(params["w1"].reshape(A * C1, K1)).reshape(K1 * A * C1, 1),
        (K1 * A * C1, LANES))
    b1b = jnp.broadcast_to(params["b1"].reshape(A * C1, 1), (A * C1, LANES))
    w2bd = jnp.zeros((K2 * A * C2, LANES), f32)
    for k in range(K2):
        for a in range(A):
            w2bd = w2bd.at[k * A * C2 + a * C2:k * A * C2 + (a + 1) * C2,
                           a * C1:(a + 1) * C1].set(params["w2"][a, :, :, k])
    b2b = jnp.broadcast_to(params["b2"].reshape(A * C2, 1), (A * C2, LANES))
    lane = jnp.arange(LANES) % HALF
    mask1 = (lane < L1).astype(f32)[None, :]
    mask2 = (lane < L2).astype(f32)[None, :]
    fc2b = jnp.pad(params["fc2_b"].reshape(1, A * ACLS),
                   ((0, 0), (0, LANES - A * ACLS)))
    z7 = jnp.zeros((7, LANES), f32)
    slab = jnp.concatenate(
        [w1b, b1b, w2bd, b2b, mask1, z7, mask2, z7, fc2b, z7], axis=0)
    assert slab.shape == (SLAB_ROWS, LANES)

    # -- block-diagonal fc weights (lane-dense); fc1 bias rides as the trailing row --
    fc1op = jnp.zeros((A * C2 + 1, A * FC1), f32)
    for a in range(A):
        fc1op = fc1op.at[a * C2:(a + 1) * C2, a * FC1:(a + 1) * FC1].set(
            params["fc1_w"][a].T)                       # (C2, FC1) = Linear.weight.T
    fc1op = fc1op.at[A * C2, :].set(params["fc1_b"].reshape(A * FC1))
    fc2op = jnp.zeros((A * ACLS, A * FC1), f32)
    for a in range(A):
        fc2op = fc2op.at[a * ACLS:(a + 1) * ACLS, a * FC1:(a + 1) * FC1].set(
            params["fc2_w"][a])                         # (ACLS, FC1) native layout

    vmem = pl.BlockSpec(memory_space=pltpu.MemorySpace.VMEM)
    out = pl.pallas_call(
        aspect_kernel,
        out_shape=jax.ShapeDtypeStruct((B, A * ACLS), jnp.float32),
        in_specs=[vmem] * 4,
        out_specs=vmem,
    )(hs_packed, slab, fc1op, fc2op)
    return jnp.transpose(out.reshape(B, A, ACLS), (1, 0, 2))                 # (A, B, ACLS)


def reference_forward(hs, params):
    """Pure-JAX reference replicating the PyTorch forward (eval mode)."""
    pooled = hs.mean(axis=1)                 # (B, H)
    dn = ("NCH", "OIH", "NCH")
    outs = []
    for a in range(A):
        x = pooled[:, None, :]               # (B, 1, H)
        y1 = lax.conv_general_dilated(x, params["w1"][a], (1,), [(P1, P1)],
                                      dimension_numbers=dn)
        y1 = jnp.maximum(y1 + params["b1"][a][None, :, None], 0.0)
        y2 = lax.conv_general_dilated(y1, params["w2"][a], (1,), [(P2, P2)],
                                      dimension_numbers=dn)
        y2 = jnp.maximum(y2 + params["b2"][a][None, :, None], 0.0)
        p = y2.max(axis=2)                   # (B, C2)
        h1 = jnp.maximum(p @ params["fc1_w"][a].T + params["fc1_b"][a], 0.0)
        h2 = jnp.maximum(h1 @ params["fc2_w"][a].T + params["fc2_b"][a], 0.0)
        outs.append(jax.nn.log_softmax(h2, axis=1))
    return jnp.stack(outs)                   # (A, B, ACLS)


def init_params(key):
    ks = jax.random.split(key, 8)
    def u(k, shape, fan_in):
        bound = 1.0 / jnp.sqrt(jnp.float32(fan_in))
        return jax.random.uniform(k, shape, jnp.float32, -bound, bound)
    return {
        "w1": u(ks[0], (A, C1, 1, K1), 1 * K1),
        "b1": u(ks[1], (A, C1), 1 * K1),
        "w2": u(ks[2], (A, C2, C1, K2), C1 * K2),
        "b2": u(ks[3], (A, C2), C1 * K2),
        "fc1_w": u(ks[4], (A, FC1, C2), C2),
        "fc1_b": u(ks[5], (A, FC1), C2),
        "fc2_w": u(ks[6], (A, ACLS, FC1), FC1),
        "fc2_b": u(ks[7], (A, ACLS), FC1),
    }


if __name__ == "__main__":
    key = jax.random.PRNGKey(0)
    k_hs, k_p = jax.random.split(key)
    # Synthetic stand-in for pretrained_model(**input).last_hidden_state
    hs = jax.random.normal(k_hs, (B, S, H), dtype=jnp.float32)
    params = init_params(k_p)

    out = complex_aspect_forward(hs, params)
    out = jax.block_until_ready(out)

    ref = jax.block_until_ready(reference_forward(hs, params))
    assert out.shape == (A, B, ACLS)
    assert jnp.allclose(out, ref, atol=2e-3, rtol=2e-3), (
        f"max abs err {jnp.max(jnp.abs(out - ref))}")

    print("KERNEL_OK")
</pallas_src>

<mosaic_0001>
module attributes {stable_mosaic.version = 11 : i64} {
  func.func @aspect_kernel(%arg0: memref<8x128xf32, #tpu.memory_space<vmem>>, %arg1: memref<232x128xf32, #tpu.memory_space<vmem>>, %arg2: memref<17x2048xf32, #tpu.memory_space<vmem>>, %arg3: memref<16x2048xf32, #tpu.memory_space<vmem>>, %arg4: memref<2x16xf32, #tpu.memory_space<vmem>>) attributes {dimension_semantics = [], scalar_prefetch = 0 : i64, scratch_operands = 0 : i64, tpu.core_type = #tpu.core_type<tc>} {
    %c0 = arith.constant 0 : index
    %c0_0 = arith.constant 0 : index
    %0 = vector.load %arg0[%c0, %c0_0] : memref<8x128xf32, #tpu.memory_space<vmem>>, vector<8x128xf32>
    %cst = arith.constant dense<0.000000e+00> : vector<128xf32>
    %1 = vector.multi_reduction <add>, %0, %cst [0] : vector<8x128xf32> to vector<128xf32>
    %2 = vector.shape_cast %1 : vector<128xf32> to vector<1x128xf32>
    %cst_1 = arith.constant 8.000000e+00 : f32
    %3 = vector.broadcast %cst_1 : f32 to vector<1x128xf32>
    %4 = arith.divf %2, %3 : vector<1x128xf32>
    %c0_2 = arith.constant 0 : index
    %c0_3 = arith.constant 0 : index
    %5 = vector.load %arg1[%c0_2, %c0_3] : memref<232x128xf32, #tpu.memory_space<vmem>>, vector<32x128xf32>
    %6 = vector.broadcast %4 : vector<1x128xf32> to vector<32x128xf32>
    %7 = arith.mulf %5, %6 : vector<32x128xf32>
    %c32 = arith.constant 32 : index
    %c0_4 = arith.constant 0 : index
    %8 = vector.load %arg1[%c32, %c0_4] : memref<232x128xf32, #tpu.memory_space<vmem>>, vector<32x128xf32>
    %c127_i32 = arith.constant 127 : i32
    %9 = tpu.dynamic_rotate %4 by %c127_i32 dim 1 : vector<1x128xf32>, i32 -> vector<1x128xf32>
    %10 = vector.broadcast %9 : vector<1x128xf32> to vector<32x128xf32>
    %11 = arith.mulf %8, %10 : vector<32x128xf32>
    %12 = arith.addf %7, %11 : vector<32x128xf32>
    %c64 = arith.constant 64 : index
    %c0_5 = arith.constant 0 : index
    %13 = vector.load %arg1[%c64, %c0_5] : memref<232x128xf32, #tpu.memory_space<vmem>>, vector<32x128xf32>
    %c126_i32 = arith.constant 126 : i32
    %14 = tpu.dynamic_rotate %4 by %c126_i32 dim 1 : vector<1x128xf32>, i32 -> vector<1x128xf32>
    %15 = vector.broadcast %14 : vector<1x128xf32> to vector<32x128xf32>
    %16 = arith.mulf %13, %15 : vector<32x128xf32>
    %17 = arith.addf %12, %16 : vector<32x128xf32>
    %c96 = arith.constant 96 : index
    %c0_6 = arith.constant 0 : index
    %18 = vector.load %arg1[%c96, %c0_6] : memref<232x128xf32, #tpu.memory_space<vmem>>, vector<32x128xf32>
    %c125_i32 = arith.constant 125 : i32
    %19 = tpu.dynamic_rotate %4 by %c125_i32 dim 1 : vector<1x128xf32>, i32 -> vector<1x128xf32>
    %20 = vector.broadcast %19 : vector<1x128xf32> to vector<32x128xf32>
    %21 = arith.mulf %18, %20 : vector<32x128xf32>
    %22 = arith.addf %17, %21 : vector<32x128xf32>
    %c128 = arith.constant 128 : index
    %c0_7 = arith.constant 0 : index
    %23 = vector.load %arg1[%c128, %c0_7] : memref<232x128xf32, #tpu.memory_space<vmem>>, vector<32x128xf32>
    %24 = arith.addf %22, %23 : vector<32x128xf32>
    %cst_8 = arith.constant 0.000000e+00 : f32
    %25 = vector.broadcast %cst_8 : f32 to vector<32x128xf32>
    %26 = arith.maximumf %24, %25 : vector<32x128xf32>
    %c208 = arith.constant 208 : index
    %c0_9 = arith.constant 0 : index
    %27 = vector.load %arg1[%c208, %c0_9] : memref<232x128xf32, #tpu.memory_space<vmem>>, vector<1x128xf32>
    %28 = vector.broadcast %27 : vector<1x128xf32> to vector<32x128xf32>
    %29 = arith.mulf %26, %28 : vector<32x128xf32>
    %c1_i32 = arith.constant 1 : i32
    %30 = tpu.dynamic_rotate %29 by %c1_i32 dim 1 : vector<32x128xf32>, i32 -> vector<32x128xf32>
    %c192 = arith.constant 192 : index
    %c0_10 = arith.constant 0 : index
    %31 = vector.load %arg1[%c192, %c0_10] : memref<232x128xf32, #tpu.memory_space<vmem>>, vector<16x128xf32>
    %c160 = arith.constant 160 : index
    %c0_11 = arith.constant 0 : index
    %32 = vector.load %arg1[%c160, %c0_11] : memref<232x128xf32, #tpu.memory_space<vmem>>, vector<16x32xf32>
    %cst_12 = arith.constant dense<0.000000e+00> : vector<16x128xf32>
    %33 = tpu.matmul %32, %30, %cst_12 {dimension_numbers = #tpu.dot_dimension_numbers<[1], [0], [0], [1], [0, 0, 1, 1], [], []>} : vector<16x32xf32>, vector<32x128xf32>, vector<16x128xf32> -> vector<16x128xf32>
    %34 = arith.addf %31, %33 : vector<16x128xf32>
    %c176 = arith.constant 176 : index
    %c0_13 = arith.constant 0 : index
    %35 = vector.load %arg1[%c176, %c0_13] : memref<232x128xf32, #tpu.memory_space<vmem>>, vector<16x32xf32>
    %c127_i32_14 = arith.constant 127 : i32
    %36 = tpu.dynamic_rotate %30 by %c127_i32_14 dim 1 : vector<32x128xf32>, i32 -> vector<32x128xf32>
    %cst_15 = arith.constant dense<0.000000e+00> : vector<16x128xf32>
    %37 = tpu.matmul %35, %36, %cst_15 {dimension_numbers = #tpu.dot_dimension_numbers<[1], [0], [0], [1], [0, 0, 1, 1], [], []>} : vector<16x32xf32>, vector<32x128xf32>, vector<16x128xf32> -> vector<16x128xf32>
    %38 = arith.addf %34, %37 : vector<16x128xf32>
    %cst_16 = arith.constant 0.000000e+00 : f32
    %39 = vector.broadcast %cst_16 : f32 to vector<16x128xf32>
    %40 = arith.maximumf %38, %39 : vector<16x128xf32>
    %c216 = arith.constant 216 : index
    %c0_17 = arith.constant 0 : index
    %41 = vector.load %arg1[%c216, %c0_17] : memref<232x128xf32, #tpu.memory_space<vmem>>, vector<1x128xf32>
    %42 = vector.broadcast %41 : vector<1x128xf32> to vector<16x128xf32>
    %43 = arith.mulf %40, %42 : vector<16x128xf32>
    %44 = vector.extract_strided_slice %43 {offsets = [0, 0], sizes = [16, 64], strides = [1, 1]} : vector<16x128xf32> to vector<16x64xf32>
    %cst_18 = arith.constant dense<0xFF800000> : vector<16xf32>
    %45 = vector.multi_reduction <maximumf>, %44, %cst_18 [1] : vector<16x64xf32> to vector<16xf32>
    %46 = vector.shape_cast %45 : vector<16xf32> to vector<16x1xf32>
    %47 = vector.extract_strided_slice %43 {offsets = [0, 64], sizes = [16, 64], strides = [1, 1]} : vector<16x128xf32> to vector<16x64xf32>
    %cst_19 = arith.constant dense<0xFF800000> : vector<16xf32>
    %48 = vector.multi_reduction <maximumf>, %47, %cst_19 [1] : vector<16x64xf32> to vector<16xf32>
    %49 = vector.shape_cast %48 : vector<16xf32> to vector<16x1xf32>
    %cst_20 = arith.constant 0.000000e+00 : f32
    %50 = vector.broadcast %cst_20 : f32 to vector<16x6xf32>
    %51 = tpu.concatenate %46, %49, %50 in 1 : vector<16x1xf32>, vector<16x1xf32>, vector<16x6xf32> -> vector<16x8xf32>
    %c0_21 = arith.constant 0 : index
    %c0_22 = arith.constant 0 : index
    %52 = vector.load %arg2[%c0_21, %c0_22] : memref<17x2048xf32, #tpu.memory_space<vmem>>, vector<16x2048xf32>
    %cst_23 = arith.constant dense<0.000000e+00> : vector<8x2048xf32>
    %53 = tpu.matmul %51, %52, %cst_23 {dimension_numbers = #tpu.dot_dimension_numbers<[0], [0], [1], [1], [0, 1, 1, 1], [], []>} : vector<16x8xf32>, vector<16x2048xf32>, vector<8x2048xf32> -> vector<8x2048xf32>
    %54 = vector.extract_strided_slice %53 {offsets = [0, 0], sizes = [2, 2048], strides = [1, 1]} : vector<8x2048xf32> to vector<2x2048xf32>
    %c16 = arith.constant 16 : index
    %c0_24 = arith.constant 0 : index
    %55 = vector.load %arg2[%c16, %c0_24] : memref<17x2048xf32, #tpu.memory_space<vmem>>, vector<1x2048xf32>
    %56 = vector.broadcast %55 : vector<1x2048xf32> to vector<2x2048xf32>
    %57 = arith.addf %54, %56 : vector<2x2048xf32>
    %cst_25 = arith.constant 0.000000e+00 : f32
    %58 = vector.broadcast %cst_25 : f32 to vector<2x2048xf32>
    %59 = arith.maximumf %57, %58 : vector<2x2048xf32>
    %c0_26 = arith.constant 0 : index
    %c0_27 = arith.constant 0 : index
    %60 = vector.load %arg3[%c0_26, %c0_27] : memref<16x2048xf32, #tpu.memory_space<vmem>>, vector<16x2048xf32>
    %cst_28 = arith.constant dense<0.000000e+00> : vector<2x16xf32>
    %61 = tpu.matmul %59, %60, %cst_28 {dimension_numbers = #tpu.dot_dimension_numbers<[1], [1], [0], [0], [0, 0, 1, 0], [], []>} : vector<2x2048xf32>, vector<16x2048xf32>, vector<2x16xf32> -> vector<2x16xf32>
    %c224 = arith.constant 224 : index
    %c0_29 = arith.constant 0 : index
    %62 = vector.load %arg1[%c224, %c0_29] : memref<232x128xf32, #tpu.memory_space<vmem>>, vector<1x16xf32>
    %63 = vector.broadcast %62 : vector<1x16xf32> to vector<2x16xf32>
    %64 = arith.addf %61, %63 : vector<2x16xf32>
    %cst_30 = arith.constant 0.000000e+00 : f32
    %65 = vector.broadcast %cst_30 : f32 to vector<2x16xf32>
    %66 = arith.maximumf %64, %65 : vector<2x16xf32>
    %67 = vector.extract_strided_slice %66 {offsets = [0, 0], sizes = [2, 4], strides = [1, 1]} : vector<2x16xf32> to vector<2x4xf32>
    %cst_31 = arith.constant dense<0xFF800000> : vector<2xf32>
    %68 = vector.multi_reduction <maximumf>, %67, %cst_31 [1] : vector<2x4xf32> to vector<2xf32>
    %69 = vector.shape_cast %68 : vector<2xf32> to vector<2x1xf32>
    %70 = vector.broadcast %69 : vector<2x1xf32> to vector<2x4xf32>
    %71 = arith.subf %67, %70 : vector<2x4xf32>
    %72 = math.exp %71 : vector<2x4xf32>
    %cst_32 = arith.constant dense<0.000000e+00> : vector<2xf32>
    %73 = vector.multi_reduction <add>, %72, %cst_32 [1] : vector<2x4xf32> to vector<2xf32>
    %74 = vector.shape_cast %73 : vector<2xf32> to vector<2x1xf32>
    %75 = math.log %74 : vector<2x1xf32>
    %76 = vector.broadcast %75 : vector<2x1xf32> to vector<2x4xf32>
    %77 = arith.subf %71, %76 : vector<2x4xf32>
    %78 = vector.extract_strided_slice %66 {offsets = [0, 4], sizes = [2, 4], strides = [1, 1]} : vector<2x16xf32> to vector<2x4xf32>
    %cst_33 = arith.constant dense<0xFF800000> : vector<2xf32>
    %79 = vector.multi_reduction <maximumf>, %78, %cst_33 [1] : vector<2x4xf32> to vector<2xf32>
    %80 = vector.shape_cast %79 : vector<2xf32> to vector<2x1xf32>
    %81 = vector.broadcast %80 : vector<2x1xf32> to vector<2x4xf32>
    %82 = arith.subf %78, %81 : vector<2x4xf32>
    %83 = math.exp %82 : vector<2x4xf32>
    %cst_34 = arith.constant dense<0.000000e+00> : vector<2xf32>
    %84 = vector.multi_reduction <add>, %83, %cst_34 [1] : vector<2x4xf32> to vector<2xf32>
    %85 = vector.shape_cast %84 : vector<2xf32> to vector<2x1xf32>
    %86 = math.log %85 : vector<2x1xf32>
    %87 = vector.broadcast %86 : vector<2x1xf32> to vector<2x4xf32>
    %88 = arith.subf %82, %87 : vector<2x4xf32>
    %89 = vector.extract_strided_slice %66 {offsets = [0, 8], sizes = [2, 4], strides = [1, 1]} : vector<2x16xf32> to vector<2x4xf32>
    %cst_35 = arith.constant dense<0xFF800000> : vector<2xf32>
    %90 = vector.multi_reduction <maximumf>, %89, %cst_35 [1] : vector<2x4xf32> to vector<2xf32>
    %91 = vector.shape_cast %90 : vector<2xf32> to vector<2x1xf32>
    %92 = vector.broadcast %91 : vector<2x1xf32> to vector<2x4xf32>
    %93 = arith.subf %89, %92 : vector<2x4xf32>
    %94 = math.exp %93 : vector<2x4xf32>
    %cst_36 = arith.constant dense<0.000000e+00> : vector<2xf32>
    %95 = vector.multi_reduction <add>, %94, %cst_36 [1] : vector<2x4xf32> to vector<2xf32>
    %96 = vector.shape_cast %95 : vector<2xf32> to vector<2x1xf32>
    %97 = math.log %96 : vector<2x1xf32>
    %98 = vector.broadcast %97 : vector<2x1xf32> to vector<2x4xf32>
    %99 = arith.subf %93, %98 : vector<2x4xf32>
    %100 = vector.extract_strided_slice %66 {offsets = [0, 12], sizes = [2, 4], strides = [1, 1]} : vector<2x16xf32> to vector<2x4xf32>
    %cst_37 = arith.constant dense<0xFF800000> : vector<2xf32>
    %101 = vector.multi_reduction <maximumf>, %100, %cst_37 [1] : vector<2x4xf32> to vector<2xf32>
    %102 = vector.shape_cast %101 : vector<2xf32> to vector<2x1xf32>
    %103 = vector.broadcast %102 : vector<2x1xf32> to vector<2x4xf32>
    %104 = arith.subf %100, %103 : vector<2x4xf32>
    %105 = math.exp %104 : vector<2x4xf32>
    %cst_38 = arith.constant dense<0.000000e+00> : vector<2xf32>
    %106 = vector.multi_reduction <add>, %105, %cst_38 [1] : vector<2x4xf32> to vector<2xf32>
    %107 = vector.shape_cast %106 : vector<2xf32> to vector<2x1xf32>
    %108 = math.log %107 : vector<2x1xf32>
    %109 = vector.broadcast %108 : vector<2x1xf32> to vector<2x4xf32>
    %110 = arith.subf %104, %109 : vector<2x4xf32>
    %111 = tpu.concatenate %77, %88, %99, %110 in 1 : vector<2x4xf32>, vector<2x4xf32>, vector<2x4xf32>, vector<2x4xf32> -> vector<2x16xf32>
    %c0_39 = arith.constant 0 : index
    %c0_40 = arith.constant 0 : index
    %112 = vector.load %arg4[%c0_39, %c0_40] : memref<2x16xf32, #tpu.memory_space<vmem>>, vector<2x16xf32>
    tpu.vector_store %arg4[%c0_39, %c0_40], %111 {strides = array<i32>} : memref<2x16xf32, #tpu.memory_space<vmem>>, vector<2x16xf32>,
    return
  }
}

</mosaic_0001>

<bundles_post_ra>
// kernel: tpu_custom_call.1
= control target key start
LH: loop header
LB: loop body
LE: loop exit
PB: predicated region body
PF: predicated region fallthrough
CT: control target
= control target key end

     0   :  { %9 = vsyncpa [#allocation3], 0  ;;  %s1488_s0 = inlined_call_operand.hbm [shape: f32[8,128], index: 0, kind: input, shape index: {}]   ;;  %s1489_s1 = inlined_call_operand.hbm [shape: f32[232,128], index: 1, kind: input, shape index: {}]   ;;  %s1490_s2 = inlined_call_operand.hbm [shape: f32[17,2048], index: 2, kind: input, shape index: {}]   ;;  %s1491_s3 = inlined_call_operand.hbm [shape: f32[16,2048], index: 3, kind: input, shape index: {}]   ;;  %s1492_s4 = inlined_call_operand.hbm [shape: f32[2,16], index: 4, kind: output, shape index: {}]  }
   0x1   :  { %10 = vsyncpa [#allocation6], 0 }
   0x2   :  { %11 = vsyncpa [#allocation9], 0  ;;  %s28_s17 = sshll.u32 %s1489_s1, 4  ;;  %s29_s17 = int_to_ptr.hbm [resolvable:$true] %s28_s17 }
   0x3   :  { %12 = vsyncpa [#allocation4], 0  ;;  %s1390_s18 = smov [#allocation5]   ;;  %s18_s22 = sshll.u32 %s1488_s0, 4  ;;  %s19_s22 = int_to_ptr.hbm [resolvable:$true] %s18_s22 }
   0x4   :  { %s30_s19 = sshll.u32 %s1390_s18, 4  ;;  %s1391_s23 = smov 128   ;;  %s31_s19 = int_to_ptr.vmem [resolvable:$true] %s30_s19 }
   0x5   :  { %s1392_s24 = smov 8   ;;  %s1393_s25 = smov [#allocation2]  }
   0x6   :  { %36 = dma.hbm_to_vmem [thread:$0]  %s29_s17, 3712, %s31_s19, [#allocation6], %s1391_s23, %s1391_s23, %s1392_s24  }
   0x7   :  { %s20_s26 = sshll.u32 %s1393_s25, 4  ;;  %s41_s29 = sshll.u32 %s1490_s2, 4  ;;  %s21_s26 = int_to_ptr.vmem [resolvable:$true] %s20_s26  ;;  %s42_s29 = int_to_ptr.hbm [resolvable:$true] %s41_s29 }
   0x8   :  { %23 = dma.hbm_to_vmem [thread:$0]  %s19_s22, 128, %s21_s26, [#allocation3]  }
   0x9   :  { %s1394_s1 = smov [#allocation7]   ;;  %s54_s7 = sshll.u32 %s1491_s3, 4  ;;  %s55_s7 = int_to_ptr.hbm [resolvable:$true] %s54_s7 }
   0xa   :  { %s43_s30 = sshll.u32 %s1394_s1, 4  ;;  %s1395_s0 = smov 2048   ;;  %s44_s30 = int_to_ptr.vmem [resolvable:$true] %s43_s30 }
   0xb   :  { %49 = dma.hbm_to_vmem [thread:$0]  %s42_s29, 6144, %s44_s30, [#allocation6], %s1395_s0, %s1395_s0, %s1391_s23  }
   0xc   :  { %s1396_s8 = smov [#allocation8]  }
   0xd   :  { %s56_s9 = sshll.u32 %s1396_s8, 4  ;;  %s57_s9 = int_to_ptr.vmem [resolvable:$true] %s56_s9 }
   0xe   :  { %62 = dma.hbm_to_vmem [thread:$0]  %s55_s7, 4096, %s57_s9, [#allocation9], %s1395_s0, %s1395_s0, %s1391_s23  }
   0xf   :  { %1382 = dma.done.wait [#allocation3], 128  }
  0x10   :  { %1383 = vsyncadd [#allocation3], 4294967168 }
  0x11   :  { %1384 = dma.done.wait [#allocation6], 9856  }
  0x12   :  { %1385 = vsyncadd [#allocation6], 4294957440 }
  0x13   :  { %1386 = dma.done.wait [#allocation9], 4096  }
  0x14   :  { %1387 = vsyncadd [#allocation9], 4294963200  ;;  %v1397_v0 = vmov 8.0   ;;  %v79_v2 = vld [vmem:[#allocation2] sm:$0xff]  ;;  %s1398_s2 = smov 127   ;;  %s1399_s3 = smov 125  }
  0x15   :  { %1244 = vrcp.f32 %v1397_v0  ;;  %v80_v3 = vrot.slane %v79_v2, 4  ;;  %s1400_s10 = smov 126   ;;  %v94_v16 = vld [vmem:[#allocation5] sm:$0xff]  ;;  %v95_v17 = vld [vmem:[#allocation5 + $0x8] sm:$0xff]  ;;  %v96_v19 = vld [vmem:[#allocation5 + $0x10] sm:$0xff]  ;;  %s1401_s11 = smov 1  }
  0x16   :  { %v97_v20 = vld [vmem:[#allocation5 + $0x18] sm:$0xff]  ;;  %v102_v21 = vld [vmem:[#allocation5 + $0x20] sm:$0xff]  ;;  %v103_v23 = vld [vmem:[#allocation5 + $0x28] sm:$0xff]  ;;  %vm177_vm1 = vcmask 261120   ;;  %vm263_vm2 = vcmask 1048064   ;;  %vm256_vm3 = vcmask 523264  }
  0x17   :  { %v81_v5 = vadd.f32 %v80_v3, %v79_v2  ;;  %v104_v24 = vld [vmem:[#allocation5 + $0x30] sm:$0xff]  ;;  %v105_v25 = vld [vmem:[#allocation5 + $0x38] sm:$0xff]  ;;  %v132_v31 = vld [vmem:[#allocation5 + $0x60] sm:$0xff]  ;;  %vm270_vm4 = vcmask 7168   ;;  %vm273_vm5 = vcmask 15360   ;;  %vm340_vm6 = vcmask 130048  }
  0x18   :  { %v133_v36 = vld [vmem:[#allocation5 + $0x68] sm:$0xff]  ;;  %v134_v37 = vld [vmem:[#allocation5 + $0x70] sm:$0xff]  ;;  %v135_v38 = vld [vmem:[#allocation5 + $0x78] sm:$0xff]  ;;  %vm1123_vm7 = vcmask 91200   ;;  %vm1106_vm8 = vcmask 58400   ;;  %vm1140_vm9 = vcmask 124000  }
  0x19   :  { %v82_v7 = vrot.slane %v81_v5, 2  ;;  %v117_v39 = vld [vmem:[#allocation5 + $0x40] sm:$0xff]  ;;  %v118_v40 = vld [vmem:[#allocation5 + $0x48] sm:$0xff]  ;;  %v119_v41 = vld [vmem:[#allocation5 + $0x50] sm:$0xff]  ;;  %vm1093_vm10 = vcmask 25600   ;;  %s1402_s12 = smov 120  }
  0x1a   :  { %v120_v42 = vld [vmem:[#allocation5 + $0x58] sm:$0xff]  ;;  %v149_v59 = vld [vmem:[#allocation5 + $0x90] sm:$0xff]  ;;  %v147_v63 = vld [vmem:[#allocation5 + $0x80] sm:$0xff]  ;;  %s1403_s13 = smov 124   ;;  %s1404_s14 = smov 116   ;;  %vm1157_vm11 = vcmask 31744  }
  0x1b   :  { %v1245_v1 = vpop.eup %1244  ;;  %v83_v9 = vadd.f32 %v82_v7, %v81_v5  ;;  %v150_v62 = vld [vmem:[#allocation5 + $0x98] sm:$0xff]  ;;  %v148_v0 = vld [vmem:[#allocation5 + $0x88] sm:$0xff]  ;;  %v1241_v7 = vld [vmem:[#allocation5 + $0xd0] ss:$0 sm:$0xff]  ;;  %vm1159_vm12 = vcmask 64512   ;;  %s1405_s15 = smov [#allocation10]  }
  0x1c   :  { %v87_v4 = vmul.f32 8.0, %v1245_v1  ;;  %vm91_vm0 = vweird.f32 %v1245_v1  ;;  %s1170_s16 = sshll.u32 %s1405_s15, 4  ;;  %s1172_s19 = sshll.u32 %s1492_s4, 4  ;;  %vm1161_vm13 = vcmask 97280   ;;  %vm1163_vm14 = vcmask 123904   ;;  %s1171_s16 = int_to_ptr.vmem [resolvable:$true] %s1170_s16  ;;  %s1173_s19 = int_to_ptr.hbm [resolvable:$true] %s1172_s19 }
  0x1d   :  { %v84_v11 = vrot.slane %v83_v9, 1 }
  0x1e   :  { %v88_v6 = vsub.f32 1.0, %v87_v4 }
  0x1f   :  { %v85_v13 = vadd.f32 %v84_v11, %v83_v9 }
  0x20   :  { %v89_v8 = vmul.f32 %v1245_v1, %v88_v6 }
  0x22   :  { %v90_v10 = vadd.f32 %v1245_v1, %v89_v8 }
  0x24   :  { %v92_v12 = vsel %vm91_vm0, %v1245_v1, %v90_v10 }
  0x25   :  { %v93_v14 = vmul.f32 %v92_v12, %v85_v13 }
  0x27   :  { %106 = vrot.lane.b32.xlu0 %v93_v14, %s1398_s2  ;;  %136 = vrot.lane.b32.xlu1 %v93_v14, %s1399_s3  ;;  %v98_v27 = vmul.f32 %v94_v16, %v93_v14  ;;  %v99_v28 = vmul.f32 %v95_v17, %v93_v14  ;;  %v100_v29 = vmul.f32 %v96_v19, %v93_v14 }
  0x28   :  { %v101_v30 = vmul.f32 %v97_v20, %v93_v14 }
  0x2f   :  { %121 = vrot.lane.b32.xlu0 %v93_v14, %s1400_s10 }
  0x99   :  { %v107_v15 = vpop.permute.xlu0 %106  ;;  %v137_v18 = vpop.permute.xlu1 %136 }
  0x9a   :  { %v108_v22 = vperm.slane %v107_v15, 0  ;;  %v138_v26 = vperm.slane %v137_v18, 0 }
  0x9c   :  { %v109_v32 = vmul.f32 %v108_v22, %v102_v21  ;;  %v110_v33 = vmul.f32 %v108_v22, %v103_v23  ;;  %v111_v34 = vmul.f32 %v108_v22, %v104_v24  ;;  %v112_v35 = vmul.f32 %v108_v22, %v105_v25 }
  0x9d   :  { %v139_v44 = vmul.f32 %v138_v26, %v132_v31  ;;  %v140_v46 = vmul.f32 %v138_v26, %v133_v36  ;;  %v141_v47 = vmul.f32 %v138_v26, %v134_v37  ;;  %v142_v48 = vmul.f32 %v138_v26, %v135_v38  ;;  %v175_v26 = vld [vmem:[#allocation5 + $0xa0] sm:$0xff] }
  0x9e   :  { %v113_v49 = vadd.f32 %v109_v32, %v98_v27  ;;  %v114_v50 = vadd.f32 %v110_v33, %v99_v28  ;;  %v115_v51 = vadd.f32 %v111_v34, %v100_v29  ;;  %v116_v52 = vadd.f32 %v112_v35, %v101_v30  ;;  %v176_v27 = vld [vmem:[#allocation5 + $0xa8] sm:$0xff]  ;;  %v209_v34 = vld [vmem:[#allocation5 + $0xb0] sm:$0xff]  ;;  %v210_v35 = vld [vmem:[#allocation5 + $0xb8] sm:$0xff] }
  0x9f   :  { %v173_v37 = vld [vmem:[#allocation5 + $0xc0] sm:$0xff] }
  0xa1   :  { %v122_v43 = vpop.permute.xlu0 %121 }
  0xa2   :  { %v123_v45 = vperm.slane %v122_v43, 0 }
  0xa4   :  { %v124_v53 = vmul.f32 %v123_v45, %v117_v39  ;;  %v125_v54 = vmul.f32 %v123_v45, %v118_v40  ;;  %v126_v55 = vmul.f32 %v123_v45, %v119_v41  ;;  %v127_v56 = vmul.f32 %v123_v45, %v120_v42  ;;  %v1242_v41 = vld [vmem:[#allocation5 + $0xd8] ss:$0 sm:$0xff]  ;;  %v174_v42 = vld [vmem:[#allocation5 + $0xc8] sm:$0xff] }
  0xa6   :  { %v130_v57 = vadd.f32 %v126_v55, %v115_v51  ;;  %v131_v58 = vadd.f32 %v127_v56, %v116_v52  ;;  %v128_v60 = vadd.f32 %v124_v53, %v113_v49  ;;  %v129_v61 = vadd.f32 %v125_v54, %v114_v50  ;;  %v292_v55 = vld [vmem:[#allocation7 + $0x80] sm:$0xff]  ;;  %v293_v56 = vld [vmem:[#allocation7 + $0x88] sm:$0xff] }
  0xa7   :  { %358 = vmatpush.msra.mxu2 %v292_v55  ;;  %378 = vmatpush.msra.mxu3 %v293_v56 }
  0xa8   :  { %v145_v1 = vadd.f32 %v141_v47, %v130_v57  ;;  %v146_v2 = vadd.f32 %v142_v48, %v131_v58  ;;  %v143_v3 = vadd.f32 %v139_v44, %v128_v60  ;;  %v144_v4 = vadd.f32 %v140_v46, %v129_v61  ;;  %v298_v57 = vld [vmem:[#allocation7 + $0xb0] sm:$0xff]  ;;  %v299_v58 = vld [vmem:[#allocation7 + $0xb8] sm:$0xff]  ;;  %v277_v60 = vld [vmem:[#allocation7 + $0x8] sm:$0xff] }
  0xa9   :  { %v282_v61 = vld [vmem:[#allocation7 + $0x30] sm:$0xff]  ;;  %379 = vmatpush.msra.mxu3 %v277_v60  ;;  %v763_v60 = vld [vmem:[#allocation8 + $0xc8] sm:$0xff] }
  0xaa   :  { %v153_v5 = vadd.f32 %v149_v59, %v145_v1  ;;  %v154_v6 = vadd.f32 %v150_v62, %v146_v2  ;;  %v151_v8 = vadd.f32 %v147_v63, %v143_v3  ;;  %v152_v9 = vadd.f32 %v148_v0, %v144_v4  ;;  %v276_v59 = vld [vmem:[#allocation7] sm:$0xff]  ;;  %v283_v62 = vld [vmem:[#allocation7 + $0x38] sm:$0xff] }
  0xab   :  { %359 = vmatpush.msra.mxu2 %v276_v59  ;;  %v762_v59 = vld [vmem:[#allocation8 + $0xc0] sm:$0xff] }
  0xac   :  { %v157_v10 = vmax.f32 %v153_v5, 0.0  ;;  %v158_v11 = vmax.f32 %v154_v6, 0.0  ;;  %v155_v12 = vmax.f32 %v151_v8, 0.0  ;;  %v156_v13 = vmax.f32 %v152_v9, 0.0  ;;  %v295_v8 = vld [vmem:[#allocation7 + $0x98] sm:$0xff]  ;;  %v278_v9 = vld [vmem:[#allocation7 + $0x10] sm:$0xff] }
  0xad   :  { %418 = vmatpush.msrb.mxu3 %v295_v8 }
  0xae   :  { %v163_v14 = vmul.f32 %v1241_v7, %v157_v10  ;;  %v164_v15 = vmul.f32 %v1241_v7, %v158_v11  ;;  %v161_v16 = vmul.f32 %v1241_v7, %v155_v12  ;;  %v162_v17 = vmul.f32 %v1241_v7, %v156_v13  ;;  %v294_v7 = vld [vmem:[#allocation7 + $0x90] sm:$0xff]  ;;  %v303_v11 = vld [vmem:[#allocation7 + $0xd8] sm:$0xff] }
  0xaf   :  { %398 = vmatpush.msrb.mxu2 %v294_v7  ;;  %v302_v10 = vld [vmem:[#allocation7 + $0xd0] sm:$0xff]  ;;  %v279_v12 = vld [vmem:[#allocation7 + $0x18] sm:$0xff] }
  0xb0   :  { %v1221_v18 = vpack.i.bf16 %v163_v14, %v164_v15  ;;  %v1226_v19 = vpack.i.bf16 %v161_v16, %v162_v17  ;;  %v286_v13 = vld [vmem:[#allocation7 + $0x50] sm:$0xff]  ;;  %v287_v14 = vld [vmem:[#allocation7 + $0x58] sm:$0xff]  ;;  %419 = vmatpush.msrb.mxu3 %v279_v12  ;;  %v296_v16 = vld [vmem:[#allocation7 + $0xa0] sm:$0xff] }
  0xb1   :  { %399 = vmatpush.msrb.mxu2 %v278_v9  ;;  %v297_v17 = vld [vmem:[#allocation7 + $0xa8] sm:$0xff]  ;;  %v764_v9 = vld [vmem:[#allocation8 + $0xd0] sm:$0xff] }
  0xb2   :  { %1222 = vrot.lane.b32.xlu1 %v1221_v18, %s1401_s11  ;;  %1227 = vrot.lane.b32.xlu2 %v1226_v19, %s1401_s11  ;;  %v306_v18 = vld [vmem:[#allocation7 + $0xf0] sm:$0xff]  ;;  %v307_v19 = vld [vmem:[#allocation7 + $0xf8] sm:$0xff] }
 0x10c   :  { %v1228_v20 = vpop.permute.xlu2 %1227 }
 0x10d   :  { %v1230_v21 = vunpack.i.h.bf16 %v1228_v20  ;;  %v1229_v22 = vunpack.i.l.bf16 %v1228_v20  ;;  %1237 = vrot.lane.b32.xlu0 %v1228_v20, %s1398_s2  ;;  %v280_v20 = vld [vmem:[#allocation7 + $0x20] sm:$0xff] }
 0x124   :  { %v1223_v23 = vpop.permute.xlu1 %1222 }
 0x125   :  { %v1224_v24 = vunpack.i.l.bf16 %v1223_v23  ;;  %v1225_v25 = vunpack.i.h.bf16 %v1223_v23  ;;  %1232 = vrot.lane.b32.xlu2 %v1223_v23, %s1398_s2  ;;  %v291_v23 = vld [vmem:[#allocation7 + $0x78] sm:$0xff] }
 0x127   :  { %196 = vmatpush.msra.mxu0 %v1224_v24  ;;  %v300_v24 = vld [vmem:[#allocation7 + $0xc0] sm:$0xff] }
 0x129   :  { %197 = vmatpush.msra.mxu0 %v1225_v25  ;;  %v301_v25 = vld [vmem:[#allocation7 + $0xc8] sm:$0xff] }
 0x12b   :  { %198 = vmatpush.msra.mxu0 %v1229_v22  ;;  %v290_v22 = vld [vmem:[#allocation7 + $0x70] sm:$0xff] }
 0x12d   :  { %199 = vmatpush.msra.mxu0 %v1230_v21  ;;  %v281_v21 = vld [vmem:[#allocation7 + $0x28] sm:$0xff] }
 0x12e   :  { %1184 = vmatmul.msk.f32.vlgmr.msra.gmra.mxu0 %vm177_vm1, %v175_v26  ;;  %v284_v26 = vld [vmem:[#allocation7 + $0x40] sm:$0xff] }
 0x12f   :  { %478 = vmatpush.msrb.mxu0 %v298_v57 }
 0x131   :  { %479 = vmatpush.msrb.mxu0 %v282_v61 }
 0x133   :  { %558 = vmatpush.msra.mxu0 %v302_v10  ;;  %v765_v10 = vld [vmem:[#allocation8 + $0xd8] sm:$0xff] }
 0x135   :  { %559 = vmatpush.msra.mxu0 %v286_v13  ;;  %v669_v13 = vld [vmem:[#allocation7 + $0x140] ss:$8 sm:$0xf] }
 0x136   :  { %1185 = vmatmul.msk.f32.gmra.mxu0 %vm177_vm1, %v176_v27  ;;  %v285_v27 = vld [vmem:[#allocation7 + $0x48] sm:$0xff] }
 0x17f   :  { %v1233_v28 = vpop.permute.xlu2 %1232  ;;  %v1238_v30 = vpop.permute.xlu0 %1237 }
 0x180   :  { %v1234_v29 = vunpack.i.l.bf16 %v1233_v28  ;;  %v1235_v31 = vunpack.i.h.bf16 %v1233_v28  ;;  %v1239_v32 = vunpack.i.l.bf16 %v1238_v30  ;;  %v1240_v33 = vunpack.i.h.bf16 %v1238_v30  ;;  %v304_v28 = vld [vmem:[#allocation7 + $0xe0] sm:$0xff] }
 0x181   :  { %v288_v30 = vld [vmem:[#allocation7 + $0x60] sm:$0xff] }
 0x182   :  { %237 = vmatpush.msra.mxu1 %v1234_v29  ;;  %v305_v29 = vld [vmem:[#allocation7 + $0xe8] sm:$0xff] }
 0x184   :  { %238 = vmatpush.msra.mxu1 %v1235_v31  ;;  %v289_v31 = vld [vmem:[#allocation7 + $0x68] sm:$0xff] }
 0x186   :  { %239 = vmatpush.msra.mxu1 %v1239_v32  ;;  %v754_v32 = vld [vmem:[#allocation8 + $0x80] sm:$0xff] }
 0x188   :  { %240 = vmatpush.msra.mxu1 %v1240_v33  ;;  %v755_v33 = vld [vmem:[#allocation8 + $0x88] sm:$0xff] }
 0x189   :  { %1186 = vmatmul.msk.f32.vlgmr.msra.gmra.mxu1 %vm177_vm1, %v209_v34  ;;  %v738_v34 = vld [vmem:[#allocation8] sm:$0xff] }
 0x18a   :  { %498 = vmatpush.msrb.mxu1 %v299_v58 }
 0x18c   :  { %499 = vmatpush.msrb.mxu1 %v283_v62 }
 0x18e   :  { %578 = vmatpush.msra.mxu1 %v303_v11 }
 0x190   :  { %579 = vmatpush.msra.mxu1 %v287_v14  ;;  %v670_v14 = vld [vmem:[#allocation7 + $0x140] ss:$8 sm:$0xf0] }
 0x191   :  { %1187 = vmatmul.msk.f32.gmra.mxu1 %vm177_vm1, %v210_v35  ;;  %v739_v35 = vld [vmem:[#allocation8 + $0x8] sm:$0xff] }
 0x1ab   :  { %v201_v36 = vpop.f32.mrf.mxu0 }
 0x1ac   :  { %v207_v38 = vadd.f32 %v201_v36, %v173_v37  ;;  %v756_v36 = vld [vmem:[#allocation8 + $0x90] sm:$0xff]  ;;  %v757_v37 = vld [vmem:[#allocation8 + $0x98] sm:$0xff] }
 0x1b3   :  { %v204_v43 = vpop.f32.mrf.mxu0 }
 0x1b4   :  { %v208_v45 = vadd.f32 %v204_v43, %v174_v42  ;;  %v760_v42 = vld [vmem:[#allocation8 + $0xb0] sm:$0xff]  ;;  %v761_v43 = vld [vmem:[#allocation8 + $0xb8] sm:$0xff] }
 0x206   :  { %v242_v39 = vpop.f32.mrf.mxu1 }
 0x207   :  { %v248_v40 = vadd.f32 %v242_v39, %v207_v38  ;;  %v740_v38 = vld [vmem:[#allocation8 + $0x10] sm:$0xff]  ;;  %v741_v39 = vld [vmem:[#allocation8 + $0x18] sm:$0xff] }
 0x209   :  { %v250_v44 = vmax.f32 %v248_v40, 0.0  ;;  %v758_v40 = vld [vmem:[#allocation8 + $0xa0] sm:$0xff] }
 0x20b   :  { %v254_v46 = vmul.f32 %v1242_v41, %v250_v44  ;;  %v742_v44 = vld [vmem:[#allocation8 + $0x20] sm:$0xff] }
 0x20d   :  { %v264_v47 = vsel %vm263_vm2, %v254_v46, -inf  ;;  %v257_v48 = vsel %vm256_vm3, %v254_v46, -inf  ;;  %v744_v46 = vld [vmem:[#allocation8 + $0x30] sm:$0xff] }
 0x20e   :  { %265 = vmax.xlane.f32.xlu2 %v264_v47  ;;  %258 = vmax.xlane.f32.xlu1 %v257_v48  ;;  %v245_v49 = vpop.f32.mrf.mxu1  ;;  %v745_v47 = vld [vmem:[#allocation8 + $0x38] sm:$0xff] }
 0x20f   :  { %v249_v50 = vadd.f32 %v245_v49, %v208_v45  ;;  %v743_v45 = vld [vmem:[#allocation8 + $0x28] sm:$0xff] }
 0x210   :  { %v665_v48 = vld [vmem:[#allocation7 + $0x100] ss:$8 sm:$0xf] }
 0x211   :  { %v251_v51 = vmax.f32 %v249_v50, 0.0  ;;  %v666_v49 = vld [vmem:[#allocation7 + $0x100] ss:$8 sm:$0xf0] }
 0x212   :  { %v667_v50 = vor.u32 %v666_v49, %v665_v48  ;;  %v752_v48 = vld [vmem:[#allocation8 + $0x70] sm:$0xff]  ;;  %v753_v49 = vld [vmem:[#allocation8 + $0x78] sm:$0xff] }
 0x213   :  { %v255_v52 = vmul.f32 %v1242_v41, %v251_v51  ;;  %v759_v41 = vld [vmem:[#allocation8 + $0xa8] sm:$0xff] }
 0x214   :  { %v674_v51 = vperm.slane %v667_v50, 0  ;;  %v676_v61 = vperm.slane %v667_v50, 2  ;;  %v677_v62 = vperm.slane %v667_v50, 3  ;;  %v680_v11 = vperm.slane %v667_v50, 6 }
 0x215   :  { %v267_v53 = vsel %vm263_vm2, %v255_v52, -inf  ;;  %v260_v54 = vsel %vm256_vm3, %v255_v52, -inf  ;;  %v675_v52 = vperm.slane %v667_v50, 1  ;;  %v681_v12 = vperm.slane %v667_v50, 7 }
 0x216   :  { %268 = vmax.xlane.f32.xlu2 %v267_v53  ;;  %261 = vmax.xlane.f32.xlu0 %v260_v54 }
 0x281   :  { %v266_v63 = vpop.xlane.xlu2 %265  ;;  %v259_v0 = vpop.xlane.xlu1 %258 }
 0x282   :  { %v271_v1 = vsel %vm270_vm4, %v259_v0, %v266_v63  ;;  %v746_v63 = vld [vmem:[#allocation8 + $0x40] sm:$0xff]  ;;  %v747_v0 = vld [vmem:[#allocation8 + $0x48] sm:$0xff] }
 0x283   :  { %v274_v2 = vsel %vm273_vm5, %v271_v1, 0.0 }
 0x284   :  { %308 = vxpose.xlu1.b32.start [1/2] (short) (narrow) %v274_v2, 8 }
 0x289   :  { %v269_v3 = vpop.xlane.xlu2 %268  ;;  %v262_v4 = vpop.xlane.xlu0 %261 }
 0x28a   :  { %v272_v5 = vsel %vm270_vm4, %v262_v4, %v269_v3 }
 0x28b   :  { %v275_v6 = vsel %vm273_vm5, %v272_v5, 0.0 }
 0x28c   :  { %309 = vxpose.xlu1.b32.end [2/2] (short) (narrow) %v275_v6, 8 }
 0x328   :  { %v324_v15 = vpop.trf.xlu1 }
 0x329   :  { %1188 = vmatmul.msk.f32.vlgmr.msra.gmra.mxu2 %vm340_vm6, %v324_v15  ;;  %1189 = vmatmul.msk.f32.vlgmr.msra.gmra.mxu3 %vm340_vm6, %v324_v15 }
 0x32a   :  { %1194 = vmatmul.msk.f32.vlgmr.msrb.gmra.mxu0 %vm340_vm6, %v324_v15  ;;  %1195 = vmatmul.msk.f32.vlgmr.msrb.gmra.mxu1 %vm340_vm6, %v324_v15 }
 0x32b   :  { %438 = vmatpush.msra.mxu2 %v296_v16  ;;  %458 = vmatpush.msra.mxu3 %v297_v17  ;;  %v679_v16 = vperm.slane %v667_v50, 5  ;;  %v748_v17 = vld [vmem:[#allocation8 + $0x50] sm:$0xff] }
 0x32c   :  { %638 = vmatpush.msrb.mxu0 %v306_v18  ;;  %658 = vmatpush.msrb.mxu1 %v307_v19  ;;  %v749_v18 = vld [vmem:[#allocation8 + $0x58] sm:$0xff] }
 0x32d   :  { %439 = vmatpush.msra.mxu2 %v280_v20  ;;  %459 = vmatpush.msra.mxu3 %v281_v21  ;;  %v1466_v21 = vor.u32 %v670_v14, %v669_v13 }
 0x32e   :  { %639 = vmatpush.msrb.mxu0 %v290_v22  ;;  %659 = vmatpush.msrb.mxu1 %v291_v23 }
 0x331   :  { %1190 = vmatmul.msk.f32.vlgmr.msrb.gmra.mxu2 %vm340_vm6, %v324_v15  ;;  %1191 = vmatmul.msk.f32.vlgmr.msrb.gmra.mxu3 %vm340_vm6, %v324_v15 }
 0x332   :  { %1198 = vmatmul.msk.f32.vlgmr.msra.gmra.mxu0 %vm340_vm6, %v324_v15  ;;  %1199 = vmatmul.msk.f32.vlgmr.msra.gmra.mxu1 %vm340_vm6, %v324_v15 }
 0x333   :  { %518 = vmatpush.msrb.mxu2 %v300_v24  ;;  %538 = vmatpush.msrb.mxu3 %v301_v25 }
 0x334   :  { %826 = vmatpush.xpose.msra.mxu0 %v756_v36  ;;  %846 = vmatpush.xpose.msra.mxu1 %v757_v37  ;;  %v682_v36 = vperm.slane %v1466_v21, 0  ;;  %v683_v37 = vperm.slane %v1466_v21, 1 }
 0x335   :  { %519 = vmatpush.msrb.mxu2 %v284_v26  ;;  %539 = vmatpush.msrb.mxu3 %v285_v27 }
 0x338   :  { %827 = vmatpush.xpose.msra.mxu0 %v740_v38  ;;  %847 = vmatpush.xpose.msra.mxu1 %v741_v39  ;;  %v768_v38 = vld [vmem:[#allocation8 + $0xf0] sm:$0xff]  ;;  %v769_v39 = vld [vmem:[#allocation8 + $0xf8] sm:$0xff] }
 0x339   :  { %1192 = vmatmul.msk.f32.vlgmr.msra.gmra.mxu2 %vm340_vm6, %v324_v15  ;;  %1193 = vmatmul.msk.f32.vlgmr.msra.gmra.mxu3 %vm340_vm6, %v324_v15 }
 0x33a   :  { %1202 = vmatmul.msk.f32.vlgmr.msrb.gmra.mxu0 %vm340_vm6, %v324_v15  ;;  %1203 = vmatmul.msk.f32.vlgmr.msrb.gmra.mxu1 %vm340_vm6, %v324_v15 }
 0x33b   :  { %598 = vmatpush.msra.mxu2 %v304_v28  ;;  %618 = vmatpush.msra.mxu3 %v305_v29 }
 0x33c   :  { %906 = vmatpush.xpose.msrb.mxu0 %v760_v42  ;;  %926 = vmatpush.xpose.msrb.mxu1 %v761_v43 }
 0x33d   :  { %599 = vmatpush.msra.mxu2 %v288_v30  ;;  %619 = vmatpush.msra.mxu3 %v289_v31 }
 0x340   :  { %907 = vmatpush.xpose.msrb.mxu0 %v744_v46  ;;  %927 = vmatpush.xpose.msrb.mxu1 %v745_v47 }
 0x341   :  { %1196 = vmatmul.msk.f32.vlgmr.msrb.gmra.mxu2 %vm340_vm6, %v324_v15  ;;  %1197 = vmatmul.msk.f32.vlgmr.msrb.gmra.mxu3 %vm340_vm6, %v324_v15 }
 0x342   :  { %786 = vmatpush.xpose.msrb.mxu2 %v754_v32  ;;  %806 = vmatpush.xpose.msrb.mxu3 %v755_v33  ;;  %v684_v32 = vperm.slane %v1466_v21, 2  ;;  %v685_v33 = vperm.slane %v1466_v21, 3 }
 0x346   :  { %787 = vmatpush.xpose.msrb.mxu2 %v738_v34  ;;  %807 = vmatpush.xpose.msrb.mxu3 %v739_v35  ;;  %v766_v34 = vld [vmem:[#allocation8 + $0xe0] sm:$0xff]  ;;  %v767_v35 = vld [vmem:[#allocation8 + $0xe8] sm:$0xff] }
 0x349   :  { %1200 = vmatmul.msk.f32.vlgmr.msra.gmra.mxu2 %vm340_vm6, %v324_v15  ;;  %1201 = vmatmul.msk.f32.vlgmr.msra.gmra.mxu3 %vm340_vm6, %v324_v15  ;;  %v678_v15 = vperm.slane %v667_v50, 4 }
 0x34a   :  { %866 = vmatpush.xpose.msra.mxu2 %v758_v40  ;;  %886 = vmatpush.xpose.msra.mxu3 %v759_v41 }
 0x34e   :  { %867 = vmatpush.xpose.msra.mxu2 %v742_v44  ;;  %887 = vmatpush.xpose.msra.mxu3 %v743_v45  ;;  %v750_v44 = vld [vmem:[#allocation8 + $0x60] sm:$0xff]  ;;  %v751_v45 = vld [vmem:[#allocation8 + $0x68] sm:$0xff] }
 0x3a7   :  { %v481_v3 = vpop.f32.mrf.mxu0  ;;  %v501_v4 = vpop.f32.mrf.mxu1 }
 0x3a8   :  { %v712_v19 = vadd.f32 %v680_v11, %v481_v3  ;;  %v713_v20 = vadd.f32 %v681_v12, %v501_v4 }
 0x3aa   :  { %v728_v30 = vmax.f32 %v712_v19, 0.0  ;;  %v729_v31 = vmax.f32 %v713_v20, 0.0 }
 0x3ac   :  { %v361_v53 = vpop.f32.mrf.mxu2  ;;  %v381_v54 = vpop.f32.mrf.mxu3 }
 0x3ad   :  { %v706_v55 = vadd.f32 %v674_v51, %v361_v53  ;;  %v707_v56 = vadd.f32 %v675_v52, %v381_v54  ;;  %v688_v54 = vperm.slane %v1466_v21, 6 }
 0x3af   :  { %v722_v57 = vmax.f32 %v706_v55, 0.0  ;;  %v723_v58 = vmax.f32 %v707_v56, 0.0  ;;  %v561_v26 = vpop.f32.mrf.mxu0  ;;  %v581_v27 = vpop.f32.mrf.mxu1  ;;  %v689_v55 = vperm.slane %v1466_v21, 7 }
 0x3b0   :  { %v716_v40 = vadd.f32 %v684_v32, %v561_v26  ;;  %v717_v41 = vadd.f32 %v685_v33, %v581_v27 }
 0x3b1   :  { %788 = vmatmul.f32.vlgmr.msrb.gmra.mxu2 %v722_v57  ;;  %808 = vmatmul.f32.vlgmr.msrb.gmra.mxu3 %v723_v58  ;;  %v686_v58 = vperm.slane %v1466_v21, 4 }
 0x3b2   :  { %946 = vmatpush.xpose.msrb.mxu2 %v762_v59  ;;  %966 = vmatpush.xpose.msrb.mxu3 %v763_v60  ;;  %v732_v52 = vmax.f32 %v716_v40, 0.0  ;;  %v733_v53 = vmax.f32 %v717_v41, 0.0  ;;  %v687_v59 = vperm.slane %v1466_v21, 5 }
 0x3b4   :  { %v401_v1 = vpop.f32.mrf.mxu2  ;;  %v421_v2 = vpop.f32.mrf.mxu3 }
 0x3b5   :  { %v708_v5 = vadd.f32 %v676_v61, %v401_v1  ;;  %v709_v6 = vadd.f32 %v677_v62, %v421_v2 }
 0x3b6   :  { %947 = vmatpush.xpose.msrb.mxu2 %v746_v63  ;;  %967 = vmatpush.xpose.msrb.mxu3 %v747_v0 }
 0x3b7   :  { %v724_v7 = vmax.f32 %v708_v5, 0.0  ;;  %v725_v8 = vmax.f32 %v709_v6, 0.0  ;;  %v641_v56 = vpop.f32.mrf.mxu0  ;;  %v661_v57 = vpop.f32.mrf.mxu1  ;;  %v1243_v6 = vld [vmem:[#allocation5 + $0xe0] ss:$0 sm:$0xff] }
 0x3b8   :  { %v720_v60 = vadd.f32 %v688_v54, %v641_v56  ;;  %v721_v61 = vadd.f32 %v689_v55, %v661_v57 }
 0x3b9   :  { %828 = vmatmul.f32.vlgmr.msra.gmra.mxu0 %v724_v7  ;;  %848 = vmatmul.f32.vlgmr.msra.gmra.mxu1 %v725_v8 }
 0x3ba   :  { %986 = vmatpush.xpose.msra.mxu0 %v764_v9  ;;  %1006 = vmatpush.xpose.msra.mxu1 %v765_v10  ;;  %v736_v4 = vmax.f32 %v720_v60, 0.0  ;;  %v737_v5 = vmax.f32 %v721_v61, 0.0 }
 0x3bc   :  { %v441_v22 = vpop.f32.mrf.mxu2  ;;  %v461_v23 = vpop.f32.mrf.mxu3 }
 0x3bd   :  { %v710_v24 = vadd.f32 %v678_v15, %v441_v22  ;;  %v711_v25 = vadd.f32 %v679_v16, %v461_v23 }
 0x3be   :  { %987 = vmatpush.xpose.msra.mxu0 %v748_v17  ;;  %1007 = vmatpush.xpose.msra.mxu1 %v749_v18 }
 0x3bf   :  { %v726_v28 = vmax.f32 %v710_v24, 0.0  ;;  %v727_v29 = vmax.f32 %v711_v25, 0.0 }
 0x3c1   :  { %868 = vmatmul.f32.vlgmr.msra.gmra.mxu2 %v726_v28  ;;  %888 = vmatmul.f32.vlgmr.msra.gmra.mxu3 %v727_v29 }
 0x3c2   :  { %908 = vmatmul.f32.vlgmr.msrb.gmra.mxu0 %v728_v30  ;;  %928 = vmatmul.f32.vlgmr.msrb.gmra.mxu1 %v729_v31 }
 0x3c3   :  { %1026 = vmatpush.xpose.msra.mxu2 %v766_v34  ;;  %1046 = vmatpush.xpose.msra.mxu3 %v767_v35 }
 0x3c4   :  { %v521_v42 = vpop.f32.mrf.mxu2  ;;  %v541_v43 = vpop.f32.mrf.mxu3  ;;  %1066 = vmatpush.xpose.msrb.mxu0 %v768_v38  ;;  %1086 = vmatpush.xpose.msrb.mxu1 %v769_v39 }
 0x3c5   :  { %v714_v46 = vadd.f32 %v682_v36, %v521_v42  ;;  %v715_v47 = vadd.f32 %v683_v37, %v541_v43 }
 0x3c7   :  { %v730_v50 = vmax.f32 %v714_v46, 0.0  ;;  %v731_v51 = vmax.f32 %v715_v47, 0.0  ;;  %1027 = vmatpush.xpose.msra.mxu2 %v750_v44  ;;  %1047 = vmatpush.xpose.msra.mxu3 %v751_v45 }
 0x3c8   :  { %1067 = vmatpush.xpose.msrb.mxu0 %v752_v48  ;;  %1087 = vmatpush.xpose.msrb.mxu1 %v753_v49 }
 0x3c9   :  { %948 = vmatmul.f32.vlgmr.msrb.gmra.mxu2 %v730_v50  ;;  %968 = vmatmul.f32.vlgmr.msrb.gmra.mxu3 %v731_v51 }
 0x3ca   :  { %988 = vmatmul.f32.vlgmr.msra.gmra.mxu0 %v732_v52  ;;  %1008 = vmatmul.f32.vlgmr.msra.gmra.mxu1 %v733_v53 }
 0x3cc   :  { %v601_v62 = vpop.f32.mrf.mxu2  ;;  %v621_v63 = vpop.f32.mrf.mxu3 }
 0x3cd   :  { %v718_v0 = vadd.f32 %v686_v58, %v601_v62  ;;  %v719_v1 = vadd.f32 %v687_v59, %v621_v63 }
 0x3cf   :  { %v734_v2 = vmax.f32 %v718_v0, 0.0  ;;  %v735_v3 = vmax.f32 %v719_v1, 0.0 }
 0x3d1   :  { %1028 = vmatmul.f32.vlgmr.msra.gmra.mxu2 %v734_v2  ;;  %1048 = vmatmul.f32.vlgmr.msra.gmra.mxu3 %v735_v3 }
 0x3d2   :  { %1068 = vmatmul.f32.vlgmr.msrb.gmra.mxu0 %v736_v4  ;;  %1088 = vmatmul.f32.vlgmr.msrb.gmra.mxu1 %v737_v5 }
 0x434   :  { %v789_v7 = vpop.f32.mrf.mxu2  ;;  %v809_v10 = vpop.f32.mrf.mxu3 }
 0x435   :  { %v790_v8 = vadd.f32 %v1243_v6, %v789_v7 }
 0x436   :  { %v829_v9 = vpop.f32.mrf.mxu0  ;;  %v849_v12 = vpop.f32.mrf.mxu1 }
 0x437   :  { %v810_v11 = vadd.f32 %v809_v10, %v790_v8 }
 0x439   :  { %v830_v13 = vadd.f32 %v829_v9, %v810_v11 }
 0x43b   :  { %v850_v14 = vadd.f32 %v849_v12, %v830_v13 }
 0x43f   :  { %v909_v15 = vpop.f32.mrf.mxu0  ;;  %v929_v19 = vpop.f32.mrf.mxu1 }
 0x444   :  { %v869_v16 = vpop.f32.mrf.mxu2  ;;  %v889_v17 = vpop.f32.mrf.mxu3 }
 0x445   :  { %v870_v18 = vadd.f32 %v869_v16, %v850_v14 }
 0x447   :  { %v890_v20 = vadd.f32 %v889_v17, %v870_v18  ;;  %v989_v26 = vpop.f32.mrf.mxu0  ;;  %v1009_v28 = vpop.f32.mrf.mxu1 }
 0x449   :  { %v910_v21 = vadd.f32 %v909_v15, %v890_v20 }
 0x44b   :  { %v930_v22 = vadd.f32 %v929_v19, %v910_v21 }
 0x44c   :  { %v949_v23 = vpop.f32.mrf.mxu2  ;;  %v969_v24 = vpop.f32.mrf.mxu3 }
 0x44d   :  { %v950_v25 = vadd.f32 %v949_v23, %v930_v22 }
 0x44f   :  { %v970_v27 = vadd.f32 %v969_v24, %v950_v25  ;;  %v1069_v35 = vpop.f32.mrf.mxu0  ;;  %v1089_v37 = vpop.f32.mrf.mxu1 }
 0x451   :  { %v990_v29 = vadd.f32 %v989_v26, %v970_v27 }
 0x453   :  { %v1010_v30 = vadd.f32 %v1009_v28, %v990_v29 }
 0x454   :  { %v1029_v31 = vpop.f32.mrf.mxu2  ;;  %v1049_v33 = vpop.f32.mrf.mxu3 }
 0x455   :  { %v1030_v32 = vadd.f32 %v1029_v31, %v1010_v30 }
 0x457   :  { %v1050_v34 = vadd.f32 %v1049_v33, %v1030_v32 }
 0x459   :  { %v1070_v36 = vadd.f32 %v1069_v35, %v1050_v34 }
 0x45b   :  { %v1090_v38 = vadd.f32 %v1089_v37, %v1070_v36 }
 0x45d   :  { %v1092_v39 = vmax.f32 %v1090_v38, 0.0 }
 0x45f   :  { %v1124_v40 = vsel %vm1123_vm7, %v1092_v39, -inf  ;;  %v1107_v41 = vsel %vm1106_vm8, %v1092_v39, -inf  ;;  %v1141_v42 = vsel %vm1140_vm9, %v1092_v39, -inf  ;;  %v1094_v43 = vsel %vm1093_vm10, %v1092_v39, -inf }
 0x460   :  { %1125 = vmax.xlane.f32.xlu0 %v1124_v40  ;;  %1108 = vmax.xlane.f32.xlu2 %v1107_v41 }
 0x468   :  { %1142 = vmax.xlane.f32.xlu2 %v1141_v42  ;;  %1095 = vmax.xlane.f32.xlu0 %v1094_v43 }
 0x4d3   :  { %v1126_v44 = vpop.xlane.xlu0 %1125  ;;  %v1109_v45 = vpop.xlane.xlu2 %1108 }
 0x4d4   :  { %v1477_v46 = vsub.f32 %v1092_v39, %v1126_v44  ;;  %v1110_v47 = vsub.f32 %v1092_v39, %v1109_v45 }
 0x4d6   :  { %v1128_v48 = vmul.f32 1.442695, %v1477_v46  ;;  %v1111_v49 = vmul.f32 1.442695, %v1110_v47 }
 0x4d8   :  { %1246 = vpow2.f32 %v1128_v48 }
 0x4d9   :  { %1248 = vpow2.f32 %v1111_v49 }
 0x4db   :  { %v1143_v50 = vpop.xlane.xlu2 %1142  ;;  %v1096_v56 = vpop.xlane.xlu0 %1095 }
 0x4dc   :  { %v1144_v51 = vsub.f32 %v1092_v39, %v1143_v50  ;;  %v1097_v57 = vsub.f32 %v1092_v39, %v1096_v56 }
 0x4de   :  { %v1247_v52 = vpop.eup %1246  ;;  %v1145_v53 = vmul.f32 1.442695, %v1144_v51  ;;  %v1098_v58 = vmul.f32 1.442695, %v1097_v57 }
 0x4df   :  { %v1249_v54 = vpop.eup %1248  ;;  %1131 = vrot.lane.b32.xlu0 %v1247_v52, %s1402_s12 }
 0x4e0   :  { %1250 = vpow2.f32 %v1145_v53  ;;  %1114 = vrot.lane.b32.xlu2 %v1249_v54, %s1403_s13 }
 0x4e1   :  { %1252 = vpow2.f32 %v1098_v58 }
 0x4e6   :  { %v1251_v55 = vpop.eup %1250 }
 0x4e7   :  { %1148 = vrot.lane.b32.xlu0 %v1251_v55, %s1404_s14  ;;  %v1253_v59 = vpop.eup %1252 }
 0x4e8   :  { %v1100_v60 = vsel %vm1093_vm10, %v1253_v59, 0.0 }
 0x509   :  { %1101 = vadd.xlane.f32.xlu2 %v1100_v60 }
 0x53a   :  { %v1115_v61 = vpop.permute.xlu2 %1114 }
 0x53b   :  { %v1117_v62 = vsel %vm1093_vm10, %v1115_v61, 0.0 }
 0x53c   :  { %1118 = vadd.xlane.f32.xlu0 %v1117_v62 }
 0x551   :  { %v1132_v63 = vpop.permute.xlu0 %1131 }
 0x552   :  { %v1134_v0 = vsel %vm1093_vm10, %v1132_v63, 0.0 }
 0x553   :  { %1135 = vadd.xlane.f32.xlu1 %v1134_v0 }
 0x559   :  { %v1149_v1 = vpop.permute.xlu0 %1148 }
 0x55a   :  { %v1151_v2 = vsel %vm1093_vm10, %v1149_v1, 0.0 }
 0x55b   :  { %1152 = vadd.xlane.f32.xlu2 %v1151_v2 }
 0x57c   :  { %v1102_v4 = vpop.xlane.xlu2 %1101 }
 0x5af   :  { %v1119_v3 = vpop.xlane.xlu0 %1118 }
 0x5b0   :  { %1254 = vlog2.f32 %v1119_v3 }
 0x5b6   :  { %v1255_v6 = vpop.eup %1254 }
 0x5b7   :  { %v1121_v10 = vmul.f32 0.6931472, %v1255_v6 }
 0x5b9   :  { %v1122_v13 = vsub.f32 %v1110_v47, %v1121_v10 }
 0x5c6   :  { %v1136_v5 = vpop.xlane.xlu1 %1135 }
 0x5c7   :  { %1256 = vlog2.f32 %v1136_v5 }
 0x5c8   :  { %1258 = vlog2.f32 %v1102_v4 }
 0x5cd   :  { %v1257_v7 = vpop.eup %1256 }
 0x5ce   :  { %v1153_v8 = vpop.xlane.xlu2 %1152  ;;  %v1259_v9 = vpop.eup %1258  ;;  %v1138_v11 = vmul.f32 0.6931472, %v1257_v7 }
 0x5cf   :  { %1260 = vlog2.f32 %v1153_v8  ;;  %v1104_v12 = vmul.f32 0.6931472, %v1259_v9 }
 0x5d0   :  { %v1139_v15 = vsub.f32 %v1477_v46, %v1138_v11 }
 0x5d1   :  { %v1105_v16 = vsub.f32 %v1097_v57, %v1104_v12 }
 0x5d3   :  { %v1158_v18 = vsel %vm1157_vm11, %v1105_v16, %v1122_v13 }
 0x5d4   :  { %v1160_v20 = vsel %vm1159_vm12, %v1158_v18, %v1139_v15 }
 0x5d5   :  { %v1261_v14 = vpop.eup %1260 }
 0x5d6   :  { %v1155_v17 = vmul.f32 0.6931472, %v1261_v14 }
 0x5d8   :  { %v1156_v19 = vsub.f32 %v1144_v51, %v1155_v17 }
 0x5da   :  { %v1162_v21 = vsel %vm1161_vm13, %v1160_v20, %v1156_v19 }
 0x5db   :  { %1164 = vst.msk [vmem:[#allocation10] sm:$0x3] %vm1163_vm14, %v1162_v21 }
 0x5dc   :  { %1175 = dma.vmem_to_hbm [thread:$0]  %s1171_s16, 32, %s1173_s19, [#allocation4]  }
 0x5dd   :  { %1388 = dma.done.wait [#allocation4], 32  }
 0x5de   :  { %1389 = vsyncadd [#allocation4], 4294967264 }
 0x5df   :  { %1180 = vsyncpa [#allocation3], 1 }
 0x5e0   :  { %1181 = vsyncpa [#allocation6], 1 }
 0x5e1   :  { %1182 = vsyncpa [#allocation9], 1 }
 0x5e2   :  { %1183 = vsyncpa [#allocation4], 1 }

</bundles_post_ra>
